<compile_context>
chip_gen: v7x
topology: tpu7x:2x2x1
jax: 0.10.0
libtpu: 0.0.40
codegen_flags: <defaults>
</compile_context>

<pallas_src>
import jax
import jax.numpy as jnp
from jax.experimental import pallas as pl
from jax.experimental.pallas import tpu as pltpu


def model_kernel(x_ref, pk_ref, o_ref):
    Bt, S, E = x_ref.shape

    # Packed / pre-fused weights (see fuse_and_pack_params):
    #   rows 0..E-1 : [Wq^T / sqrt(E) | Wk^T | Wv^T]            (E, 3E)
    #   row  E      : [bq  / sqrt(E)  | bk   | bv ]             (1, 3E)
    #   row  E+1    : [Wd @ Wo (E,) | bo@Wd^T + bd | zeros]     (1, 3E)
    w_qkv = pk_ref[0:E, :]                       # (E, 3E)
    b_qkv = pk_ref[E:E + 1, :]                   # (1, 3E)
    w_out = pk_ref[E + 1:E + 2, 0:E]             # (1, E)
    b_out = pk_ref[E + 1:E + 2, E:E + 1]         # (1, 1)

    # Fused QKV projection: ONE 2-D matmul over all Bt*S rows of the block
    # (no per-batch broadcast_to / batched einsum).
    x2 = x_ref[...].reshape(Bt * S, E)                                   # (Bt*S, E)
    qkv = jnp.dot(x2, w_qkv, preferred_element_type=jnp.float32) + b_qkv  # (Bt*S, 3E)
    qkv = qkv.reshape(Bt, S, 3 * E)
    q = qkv[..., 0:E]
    k = qkv[..., E:2 * E]
    v = qkv[..., 2 * E:3 * E]

    # Scaled dot-product attention; the 1/sqrt(E) scale is folded into Wq/bq.
    s = jnp.einsum('bqe,bke->bqk', q, k,
                   preferred_element_type=jnp.float32)                   # (Bt, S, S)
    m = jnp.max(s, axis=-1, keepdims=True)
    p = jnp.exp(s - m)
    p = p * pl.reciprocal(jnp.sum(p, axis=-1, keepdims=True), approx=False)
    attn = jnp.einsum('bqk,bke->bqe', p, v,
                      preferred_element_type=jnp.float32)                # (Bt, S, E)

    # Fused attention out-projection + Dense(4->1) + sigmoid:
    # a VPU multiply + lane reduce instead of a broadcasted batched matmul.
    z = jnp.sum(attn * w_out, axis=-1) + b_out                           # (Bt, S)
    y = 1.0 / (1.0 + jnp.exp(-z))
    # Sequence stays in the lane dim; wrapper reshapes (B,1,S)->(B,S,1)
    # (identical row-major order, metadata-only).
    o_ref[...] = y[:, None, :]                                           # (Bt, 1, S)


# Conservative lane-padded VMEM footprint per batch element (x block, qkv,
# q/k/v, s, p, attn, output + double buffering; every <=128-wide minor dim
# pads to 128 lanes).
_PER_ELEM_VMEM_BYTES = 64 * 1024


def _vmem_budget_bytes():
    """Generation-aware VMEM budget (leave ~25% headroom for compiler scratch)."""
    try:
        phys = int(pltpu.get_tpu_info().vmem_capacity_bytes)
    except Exception:
        phys = 64 << 20          # v7x-sized conservative fallback
    return (phys * 3) // 4       # v5e/v6e -> ~96 MiB, v7x -> ~48 MiB


def _pick_batch_block(B, vmem_budget):
    """Largest divisor of B that fits the VMEM budget; keep >=2 grid steps
    when possible so "parallel" can shard across v7x's two TensorCores."""
    cap = max(1, int(vmem_budget // _PER_ELEM_VMEM_BYTES))
    cap = min(cap, 2048)
    if B >= 2:
        cap = min(cap, max(1, B // 2))
    bt = min(B, cap)
    while B % bt:
        bt -= 1
    return bt


def fuse_and_pack_params(params):
    """One-time host-side weight fusion/packing (not per-call work)."""
    wq, wk, wv, bq, bk, bv, wo, bo, wd, bd = params
    E = wq.shape[0]
    scale = 1.0 / jnp.sqrt(jnp.float32(E))

    # Concatenated, pre-transposed QKV projection; attention scale folded into Q.
    w_qkv_t = jnp.concatenate([(wq * scale).T, wk.T, wv.T], axis=1)      # (E, 3E)
    b_qkv = jnp.concatenate([bq * scale, bk, bv], axis=0)                # (3E,)
    # Out-projection fused with Dense(4->1): z = attn @ (Wd Wo)^T + (bo Wd^T + bd).
    w_fused = (wd @ wo).reshape(-1)                                      # (E,)
    b_fused = jnp.dot(wd[0], bo) + bd[0]                                 # ()

    pk = jnp.zeros((E + 2, 3 * E), jnp.float32)
    pk = pk.at[0:E, :].set(w_qkv_t)
    pk = pk.at[E, :].set(b_qkv)
    pk = pk.at[E + 1, 0:E].set(w_fused)
    pk = pk.at[E + 1, E].set(b_fused)
    return pk


def model_forward(x, pk):
    B, S, E = x.shape
    vmem_budget = _vmem_budget_bytes()
    Bt = _pick_batch_block(B, vmem_budget)
    grid = (B // Bt,)

    cost = pl.CostEstimate(
        flops=int(2 * B * S * E * 3 * E + 4 * B * S * S * E + 2 * B * S * E),
        transcendentals=int(B * S * S + B * S),
        bytes_accessed=int(x.size * 4 + B * S * 4 + pk.size * 4),
    )

    out = pl.pallas_call(
        model_kernel,
        out_shape=jax.ShapeDtypeStruct((B, 1, S), jnp.float32),
        grid=grid,
        in_specs=[
            pl.BlockSpec((Bt, S, E), lambda i: (i, 0, 0)),
            pl.BlockSpec(pk.shape, lambda i: (0, 0)),    # single packed weight slab
        ],
        out_specs=pl.BlockSpec((Bt, 1, S), lambda i: (i, 0, 0)),
        compiler_params=pltpu.CompilerParams(
            dimension_semantics=("parallel",),
            vmem_limit_bytes=int(vmem_budget),
        ),
        cost_estimate=cost,
    )(x, pk)
    # (B, 1, S) and (B, S, 1) share the same row-major order: metadata-only.
    return out.reshape(B, S, 1)


def init_params(key, embed_dim=4, out_dim=1):
    ks = jax.random.split(key, 10)
    scale = 1.0 / jnp.sqrt(jnp.float32(embed_dim))
    wq = jax.random.normal(ks[0], (embed_dim, embed_dim), jnp.float32) * scale
    wk = jax.random.normal(ks[1], (embed_dim, embed_dim), jnp.float32) * scale
    wv = jax.random.normal(ks[2], (embed_dim, embed_dim), jnp.float32) * scale
    bq = jax.random.normal(ks[3], (embed_dim,), jnp.float32) * 0.1
    bk = jax.random.normal(ks[4], (embed_dim,), jnp.float32) * 0.1
    bv = jax.random.normal(ks[5], (embed_dim,), jnp.float32) * 0.1
    wo = jax.random.normal(ks[6], (embed_dim, embed_dim), jnp.float32) * scale
    bo = jax.random.normal(ks[7], (embed_dim,), jnp.float32) * 0.1
    wd = jax.random.normal(ks[8], (out_dim, embed_dim), jnp.float32) * scale
    bd = jax.random.normal(ks[9], (out_dim,), jnp.float32) * 0.1
    return (wq, wk, wv, bq, bk, bv, wo, bo, wd, bd)


def reference_forward(x, params):
    """Pure-JAX reference (unfused weights) for sanity checking."""
    wq, wk, wv, bq, bk, bv, wo, bo, wd, bd = params
    q = x @ wq.T + bq
    k = x @ wk.T + bk
    v = x @ wv.T + bv
    s = (q @ jnp.swapaxes(k, -1, -2)) / jnp.sqrt(jnp.float32(x.shape[-1]))
    p = jax.nn.softmax(s, axis=-1)
    attn = p @ v
    y = attn @ wo.T + bo
    return jax.nn.sigmoid(y @ wd.T + bd)


if __name__ == "__main__":
    key = jax.random.PRNGKey(0)
    kx, kp = jax.random.split(key)

    B, S, E = 2, 8, 4
    x = jax.random.normal(kx, (B, S, E), jnp.float32)
    params = init_params(kp, embed_dim=E, out_dim=1)

    pk = fuse_and_pack_params(params)          # one-time host-side fusion/packing
    fwd = jax.jit(model_forward)
    out = jax.block_until_ready(fwd(x, pk))

    ref = reference_forward(x, params)
    assert out.shape == (B, S, 1)
    assert jnp.allclose(out, ref, atol=1e-5, rtol=1e-5), float(jnp.max(jnp.abs(out - ref)))

    print("KERNEL_OK")
</pallas_src>

<mosaic_0001>
module attributes {stable_mosaic.version = 11 : i64} {
  func.func @model_kernel(%arg0: i32, %arg1: memref<1x8x4xf32, #tpu.memory_space<vmem>>, %arg2: memref<6x12xf32, #tpu.memory_space<vmem>>, %arg3: memref<1x1x8xf32, #tpu.memory_space<vmem>>) attributes {dimension_semantics = [#tpu.dimension_semantics<parallel>], iteration_bounds = array<i64: 2>, scalar_prefetch = 0 : i64, scratch_operands = 0 : i64, tpu.core_type = #tpu.core_type<tc>, window_params = [{transform_indices = @transform_0, window_bounds = array<i64: 1, 8, 4>}, {pipeline_mode = #tpu.pipeline_mode<synchronous>, transform_indices = @transform_1, window_bounds = array<i64: 6, 12>}, {transform_indices = @transform_2, window_bounds = array<i64: 1, 1, 8>}]} {
    %c0 = arith.constant 0 : index
    %c0_0 = arith.constant 0 : index
    %0 = vector.load %arg2[%c0, %c0_0] : memref<6x12xf32, #tpu.memory_space<vmem>>, vector<4x12xf32>
    %c4 = arith.constant 4 : index
    %c0_1 = arith.constant 0 : index
    %1 = vector.load %arg2[%c4, %c0_1] : memref<6x12xf32, #tpu.memory_space<vmem>>, vector<1x12xf32>
    %c5 = arith.constant 5 : index
    %c0_2 = arith.constant 0 : index
    %2 = vector.load %arg2[%c5, %c0_2] : memref<6x12xf32, #tpu.memory_space<vmem>>, vector<1x4xf32>
    %c5_3 = arith.constant 5 : index
    %c4_4 = arith.constant 4 : index
    %3 = vector.load %arg2[%c5_3, %c4_4] : memref<6x12xf32, #tpu.memory_space<vmem>>, vector<1x1xf32>
    %c0_5 = arith.constant 0 : index
    %c0_6 = arith.constant 0 : index
    %c0_7 = arith.constant 0 : index
    %4 = vector.load %arg1[%c0_5, %c0_6, %c0_7] : memref<1x8x4xf32, #tpu.memory_space<vmem>>, vector<1x8x4xf32>
    %5 = vector.shape_cast %4 : vector<1x8x4xf32> to vector<8x4xf32>
    %cst = arith.constant dense<0.000000e+00> : vector<8x12xf32>
    %6 = tpu.matmul %5, %0, %cst {dimension_numbers = #tpu.dot_dimension_numbers<[1], [0], [0], [1], [0, 0, 1, 1], [], []>} : vector<8x4xf32>, vector<4x12xf32>, vector<8x12xf32> -> vector<8x12xf32>
    %7 = vector.broadcast %1 : vector<1x12xf32> to vector<8x12xf32>
    %8 = arith.addf %6, %7 : vector<8x12xf32>
    %9 = vector.shape_cast %8 : vector<8x12xf32> to vector<1x8x12xf32>
    %10 = vector.extract_strided_slice %9 {offsets = [0, 0, 0], sizes = [1, 8, 4], strides = [1, 1, 1]} : vector<1x8x12xf32> to vector<1x8x4xf32>
    %11 = vector.extract_strided_slice %9 {offsets = [0, 0, 4], sizes = [1, 8, 4], strides = [1, 1, 1]} : vector<1x8x12xf32> to vector<1x8x4xf32>
    %12 = vector.extract_strided_slice %9 {offsets = [0, 0, 8], sizes = [1, 8, 4], strides = [1, 1, 1]} : vector<1x8x12xf32> to vector<1x8x4xf32>
    "tpu.trace_start"() <{level = 10 : i32, message = "bqe,bke->bqk"}> : () -> ()
    %cst_8 = arith.constant dense<0.000000e+00> : vector<1x8x8xf32>
    %13 = tpu.matmul %10, %11, %cst_8 {dimension_numbers = #tpu.dot_dimension_numbers<[2], [2], [1], [1], [0, 0, 0, 1, 1, 1], [0], [0]>} : vector<1x8x4xf32>, vector<1x8x4xf32>, vector<1x8x8xf32> -> vector<1x8x8xf32>
    "tpu.trace_stop"() : () -> ()
    %cst_9 = arith.constant dense<0xFF800000> : vector<1x8xf32>
    %14 = vector.multi_reduction <maximumf>, %13, %cst_9 [2] : vector<1x8x8xf32> to vector<1x8xf32>
    %15 = vector.shape_cast %14 : vector<1x8xf32> to vector<1x8x1xf32>
    %16 = vector.broadcast %15 : vector<1x8x1xf32> to vector<1x8x8xf32>
    %17 = arith.subf %13, %16 : vector<1x8x8xf32>
    %18 = math.exp %17 : vector<1x8x8xf32>
    %cst_10 = arith.constant dense<0.000000e+00> : vector<1x8xf32>
    %19 = vector.multi_reduction <add>, %18, %cst_10 [2] : vector<1x8x8xf32> to vector<1x8xf32>
    %20 = vector.shape_cast %19 : vector<1x8xf32> to vector<1x8x1xf32>
    %21 = tpu.reciprocal %20 : vector<1x8x1xf32> -> vector<1x8x1xf32>
    %22 = vector.broadcast %21 : vector<1x8x1xf32> to vector<1x8x8xf32>
    %23 = arith.mulf %18, %22 : vector<1x8x8xf32>
    "tpu.trace_start"() <{level = 10 : i32, message = "bqk,bke->bqe"}> : () -> ()
    %cst_11 = arith.constant dense<0.000000e+00> : vector<1x8x4xf32>
    %24 = tpu.matmul %23, %12, %cst_11 {dimension_numbers = #tpu.dot_dimension_numbers<[2], [1], [1], [2], [0, 0, 0, 1, 1, 2], [0], [0]>} : vector<1x8x8xf32>, vector<1x8x4xf32>, vector<1x8x4xf32> -> vector<1x8x4xf32>
    "tpu.trace_stop"() : () -> ()
    %25 = vector.shape_cast %2 : vector<1x4xf32> to vector<1x1x4xf32>
    %26 = vector.broadcast %25 : vector<1x1x4xf32> to vector<1x8x4xf32>
    %27 = arith.mulf %24, %26 : vector<1x8x4xf32>
    %cst_12 = arith.constant dense<0.000000e+00> : vector<1x8xf32>
    %28 = vector.multi_reduction <add>, %27, %cst_12 [2] : vector<1x8x4xf32> to vector<1x8xf32>
    %29 = vector.broadcast %3 : vector<1x1xf32> to vector<1x8xf32>
    %30 = arith.addf %28, %29 : vector<1x8xf32>
    %cst_13 = arith.constant 0.000000e+00 : f32
    %31 = vector.broadcast %cst_13 : f32 to vector<1x8xf32>
    %32 = arith.subf %31, %30 : vector<1x8xf32>
    %33 = math.exp %32 : vector<1x8xf32>
    %cst_14 = arith.constant 1.000000e+00 : f32
    %34 = vector.broadcast %cst_14 : f32 to vector<1x8xf32>
    %35 = arith.addf %34, %33 : vector<1x8xf32>
    %cst_15 = arith.constant 1.000000e+00 : f32
    %36 = vector.broadcast %cst_15 : f32 to vector<1x8xf32>
    %37 = arith.divf %36, %35 : vector<1x8xf32>
    %38 = vector.shape_cast %37 : vector<1x8xf32> to vector<1x1x8xf32>
    %c0_16 = arith.constant 0 : index
    %c0_17 = arith.constant 0 : index
    %c0_18 = arith.constant 0 : index
    %39 = vector.load %arg3[%c0_16, %c0_17, %c0_18] : memref<1x1x8xf32, #tpu.memory_space<vmem>>, vector<1x1x8xf32>
    tpu.vector_store %arg3[%c0_16, %c0_17, %c0_18], %38 {strides = array<i32>} : memref<1x1x8xf32, #tpu.memory_space<vmem>>, vector<1x1x8xf32>,
    return
  }
  func.func @transform_0(%arg0: i32) -> (i32, i32, i32) {
    %c0_i32 = arith.constant 0 : i32
    %c0_i32_0 = arith.constant 0 : i32
    %c0_i32_1 = arith.constant 0 : i32
    return %arg0, %c0_i32, %c0_i32_0 : i32, i32, i32
  }
  func.func @transform_1(%arg0: i32) -> (i32, i32) {
    %c0_i32 = arith.constant 0 : i32
    %c0_i32_0 = arith.constant 0 : i32
    %c0_i32_1 = arith.constant 0 : i32
    return %c0_i32, %c0_i32_0 : i32, i32
  }
  func.func @transform_2(%arg0: i32) -> (i32, i32, i32) {
    %c0_i32 = arith.constant 0 : i32
    %c0_i32_0 = arith.constant 0 : i32
    %c0_i32_1 = arith.constant 0 : i32
    return %arg0, %c0_i32, %c0_i32_0 : i32, i32, i32
  }
}

</mosaic_0001>

<bundles_post_ra>
// kernel: model_forward.1
= control target key start
LH: loop header
LB: loop body
LE: loop exit
PB: predicated region body
PF: predicated region fallthrough
CT: control target
= control target key end

     0   :  { %7 = vsyncpa [#allocation3], 0  ;;  %s787_s0 = inlined_call_operand.vmem [shape: f32[2,8,4], index: 0, kind: input, shape index: {}]   ;;  %s788_s1 = inlined_call_operand.vmem [shape: f32[6,12], index: 1, kind: input, shape index: {}]   ;;  %s789_s2 = inlined_call_operand.hbm [shape: f32[2,1,8], index: 2, kind: output, shape index: {}]  }
   0x1   :  { %9 = vsyncpa [#allocation3 + $0x1], 0  ;;  %s671_s9 = smov 0   ;;  %s673_s10 = smov 0  }
   0x2   :  { %s675_s11 = smov 0   ;;  %s677_s12 = smov 0  }
   0x3 LB: > { %s692_s13 = sadd.s32 4294967295, %s647_s12   ;;  %s494_s14 = sadd.s32 4294967294, %s647_s12   ;;  %s647_s12 = sphi %s677_s12, %s795_s12   ;;  %s643_s11 = sphi %s675_s11, %s794_s11   ;;  %s639_s10 = sphi %s673_s10, %s793_s10   ;;  %s635_s9 = sphi %s671_s9, %s792_s9  }
   0x4   : > { %s696_s15 = sadd.s32 1, %s647_s12   ;;  %s69_s16 = sadd.s32 1, %s643_s11 }
   0x5   : > { %s66_s17 = ssub.s32 %s647_s12, %s696_s15  ;;  %p79_p0 = scmp.ne.s32.totalorder %s643_s11, %s639_s10 }
   0x6   : > { %p67_p1 = scmp.eq.s32.totalorder %s66_s17, 0  ;;  %p80_p2 = scmp.eq.s32.totalorder %s692_s13, 1 }
   0x7   : > { %p85_p3 = scmp.ne.s32.totalorder %s639_s10, %s635_s9  ;;  %p86_p4 = scmp.eq.s32.totalorder %s494_s14, 1 }
   0x8   : > { %s707_s18 = scalar_select %p67_p1, %s643_s11, %s69_s16  }
   0x9   : > { %p709_p5 = por %p80_p2, %p79_p0  ;;  %p713_p6 = por %p86_p4, %p85_p3 }
   0xa   : > { %p497_p7 = scmp.ge.s32.totalorder %s647_s12, 1  ;;  %p114_p8 = scmp.lt.s32.totalorder %s647_s12, 3 }
   0xc   : > { %p115_p9 = pnand %p497_p7, %p114_p8 }
   0xd   : > { %v138_v0 = vld [vmem:[%s788_s1] sm:$0xf] (!%p115_p9)  ;;  %vm150_vm0 = vcmask (!%p115_p9), 1043456   ;;  %p134_p10 = scmp.lt.s32.totalorder (!%p115_p9), %s692_s13, 1  ;;  %v649_v1 = vmov (!%p115_p9), 0.0   ;;  %vm650_vm1 = vmmov (!%p115_p9), 0   ;;  %v389_v22 = vlaneseq (!%p115_p9) }
   0xe   : > { %118 = sbr.rel (%p115_p9) target bundleno = 1415 (0x587), region = 28  ;;  %514 = vmatprep.subr.mxu0 (!%p115_p9), %v649_v1  ;;  %516 = vmatprep.mubr.msk.f32.mxu0 (!%p115_p9), %vm650_vm1, %v649_v1  ;;  %vm146_vm2 = vcmask (!%p115_p9), 31744   ;;  %v499_v3 = vld [vmem:[%s788_s1 + $0x4] ss:$0 sm:$0xff] (!%p115_p9)  ;;  %s651_s30 = smov (!%p115_p9), 124   ;;  %vm301_vm3 = vcmask (!%p115_p9), 64512  }
   0xf   : > { %515 = vmatpush3.msk.msra.mxu0 (!%p115_p9), %vm150_vm0, %v138_v0  ;;  %519 = vmatprep.subr.mxu1 (!%p115_p9), %v649_v1  ;;  %s652_s3 = smov (!%p115_p9), 120   ;;  %v140_v20 = vld [vmem:[%s788_s1 + $0x5] sm:$0x1] (!%p115_p9)  ;;  %v653_v21 = vmov (!%p115_p9), 4   ;;  %v390_v23 = vshrl.u32 (!%p115_p9), %v389_v22, 7  ;;  %v654_v30 = vmov (!%p115_p9), 0  }
  0x10   : > { %521 = vmatprep.mubr.msk.f32.mxu1 (!%p115_p9), %vm650_vm1, %v649_v1  ;;  %524 = vmatprep.subr.mxu0 (!%p115_p9), %v649_v1  ;;  %s132_s6 = sand.u32 (!%p115_p9), 1, %s639_s10   ;;  %v418_v40 = vand.u32 (!%p115_p9), 127, %v389_v22  ;;  %s505_s7 = sshll.u32 (!%p115_p9), %s692_s13, 4  ;;  %vm424_vm4 = vcmask (!%p115_p9), 57344  }
  0x11   : > { %574 = vset.pattern.permute.xlu0 (!%p115_p9), %v653_v21  ;;  %v391_v24 = vsub.s32 (!%p115_p9), 0, %v390_v23  ;;  %575 = vset.pattern.permute.xlu1 (!%p115_p9), %v654_v30  ;;  %s133_s8 = scalar_lea.vmem (!%p115_p9), [#allocation2], %s132_s6  ;;  %s745_s21 = scalar_lea.hbm (!%p115_p9), %s789_s2, %s505_s7 }
  0x12   : > { %v421_v41 = vsub.s32 (!%p115_p9), %v418_v40, %v390_v23  ;;  %s439_s14 = sshll.u32 (!%p115_p9), %s133_s8, 4  ;;  %s427_s22 = scalar_lea.sflag (!%p115_p9), [#allocation3], %s132_s6  ;;  %s747_s14 = int_to_ptr.vmem [resolvable:$true] %s439_s14 }
  0x13   : > { %v392_v25 = vrot.slane (!%p115_p9), %v140_v20, %v391_v24 }
  0x15   : > { %s135_s23 = scalar_select %p134_p10, %s692_s13, 1 }
  0x16   : > { %s655_s13 = smov [#allocation2]  }
  0x17   : > { %s498_s24 = sshll.u32 %s135_s23, 3  ;;  %s585_s23 = scalar_lea.vmem %s747_s14, 16 }
  0x18   : > { %s137_s27 = scalar_lea.vmem %s787_s0, %s498_s24  ;;  %p586_p11 = scmp.ne.s32.totalorder %s747_s14, %s585_s23 }
  0x19   : > { %v141_v2 = vld [vmem:[%s137_s27] sm:$0xff]  ;;  %s589_s24 = sshll.u32 %s655_s13, 4  ;;  %s590_s24 = int_to_ptr.vmem [resolvable:$false] %s589_s24 }
  0x1a   : > { %517 = vmatmul.mubr.msk.f32.vlgmr.msra.gmra.mrb[0].mxu0 %vm146_vm2, %v141_v2  ;;  %p587_p12 = pnand %p586_p11, %p709_p5  ;;  %s591_s25 = scalar_lea.vmem %s590_s24, 32 }
  0x1b   : > { %526 = vmatprep.mubr.msk.f32.mxu0 %vm650_vm1, %v649_v1  ;;  %p592_p0 = scmp.lt.s32.totalorder %s747_s14, %s590_s24  ;;  %p593_p1 = scmp.lt.s32.totalorder %s591_s25, %s585_s23 }
  0x1c   : > { %p588_p13 = pneg %p587_p12 }
  0x1d   : > { %p594_p2 = por %p593_p1, %p592_p0 }
  0x1f   : > { %p595_p3 = pnand %p594_p2, %p588_p13 }
  0xed   : > { %v220_v4 = vpop.f32.mrb[0].mxu0 }
  0xee   : > { %v221_v5 = vadd.f32 %v499_v3, %v220_v4  ;;  %v518_v6 = vpop.f32.mrb[1].mxu0 }
  0xf0   : > { %225 = vrot.lane.b32.xlu0 %v221_v5, %s651_s30 }
 0x162   : > { %v226_v7 = vpop.permute.xlu0 %225 }
 0x163   : > { %520 = vmatpush3.xpose.msk.msra.mxu1 %vm146_vm2, %v226_v7 }
 0x166   : > { %522 = vmatmul.mubr.msk.f32.vlgmr.msra.gmra.mrb[0].mxu1 %vm146_vm2, %v221_v5 }
 0x239   : > { %v297_v8 = vpop.f32.mrb[0].mxu1 }
 0x23a   : > { %v523_v9 = vpop.f32.mrb[1].mxu1  ;;  %v302_v10 = vsel %vm301_vm3, %v297_v8, -inf }
 0x23b   : > { %303 = vmax.xlane.f32.xlu0 %v302_v10 }
 0x251   : > { %399 = vperm.xlu0 %574, %v140_v20  }
 0x255   : > { %576 = vset.pattern.permute.xlu0 %v654_v30 }
 0x2c8   : > { %v304_v11 = vpop.xlane.xlu0 %303 }
 0x2c9   : > { %v305_v12 = vsub.f32 %v297_v8, %v304_v11 }
 0x2cb   : > { %v306_v13 = vmul.f32 1.442695, %v305_v12 }
 0x2cd   : > { %577 = vpow2.f32 %v306_v13 }
 0x2d0   : > { %v400_v31 = vpop.permute.xlu0 %399 }
 0x2d1   : > { %v404_v32 = vrot.slane %v400_v31, %v391_v24 }
 0x2d7   : > { %v578_v14 = vpop.eup %577 }
 0x2d8   : > { %v308_v15 = vsel %vm301_vm3, %v578_v14, 0.0 }
 0x2d9   : > { %309 = vadd.xlane.f32.xlu1 %v308_v15 }
 0x2ea   : > { %313 = vrot.lane.b32.xlu1 %v221_v5, %s652_s3 }
 0x366   : > { %v310_v16 = vpop.xlane.xlu1 %309 }
 0x367   : > { %579 = vrcp.f32 %v310_v16 }
 0x36a   : > { %v314_v17 = vpop.permute.xlu1 %313 }
 0x36b   : > { %525 = vmatpush3.msra.mxu0 %v314_v17 }
 0x371   : > { %v580_v18 = vpop.eup %579 }
 0x372   : > { %v312_v19 = vmul.f32 %v580_v18, %v578_v14 }
 0x374   : > { %527 = vmatmul.mubr.msk.f32.vlgmr.msra.gmra.mrb[2].mxu0 %vm301_vm3, %v312_v19 }
 0x447   : > { %v385_v26 = vpop.f32.mrb[2].mxu0 }
 0x448   : > { %v393_v27 = vmul.f32 %v392_v25, %v385_v26  ;;  %v528_v28 = vpop.f32.mrb[3].mxu0 }
 0x44a   : > { %v394_v29 = vsel %vm146_vm2, %v393_v27, 0.0 }
 0x44b   : > { %395 = vadd.xlane.f32.xlu1 %v394_v29 }
 0x4d8   : > { %v396_v33 = vpop.xlane.xlu1 %395 }
 0x4d9   : > { %v406_v34 = vadd.f32 %v404_v32, %v396_v33 }
 0x4db   : > { %v407_v35 = vsub.f32 0.0, %v406_v34 }
 0x4dd   : > { %v408_v36 = vmul.f32 1.442695, %v407_v35 }
 0x4df   : > { %581 = vpow2.f32 %v408_v36 }
 0x4e9   : > { %v582_v37 = vpop.eup %581 }
 0x4ea   : > { %v410_v38 = vadd.f32 1.0, %v582_v37 }
 0x4ec   : > { %583 = vrcp.f32 %v410_v38 }
 0x4f6   : > { %v584_v39 = vpop.eup %583 }
 0x4f7   : > { %415 = vperm.xlu1 %575, %v584_v39  }
 0x576   : > { %v416_v42 = vpop.permute.xlu1 %415 }
 0x577   : > { %v422_v43 = vrot.slane %v416_v42, %v421_v41 }
 0x579   : > { %425 = vst.msk [vmem:[%s133_s8] sm:$0x1] %vm424_vm4, %v422_v43 }
 0x57a   : > { %598 = shalt.err (!%p595_p3)
}
 0x57b   : > { %s599_s26 = scalar_lea.hbm %s745_s21, 16  ;;  %s603_s29 = scalar_lea.hbm %s789_s2, 32 }
 0x57c   : > { %p600_p4 = scmp.ne.s32.totalorder %s745_s21, %s599_s26  ;;  %p604_p9 = scmp.lt.u32.totalorder %s745_s21, %s789_s2 }
 0x57d   : > { %p605_p10 = scmp.lt.u32.totalorder %s603_s29, %s599_s26  ;;  %p607_p12 = scmp.lt.u32.totalorder %s599_s26, %s745_s21 }
 0x57e   : > { %p601_p7 = pnand %p600_p4, %p709_p5 }
 0x57f   : > { %p606_p11 = por %p605_p10, %p604_p9 }
 0x580   : > { %p602_p8 = pneg %p601_p7 }
 0x581   : > { %p608_p13 = por %p607_p12, %p606_p11 }
 0x583   : > { %p609_p0 = pnand %p608_p13, %p602_p8 }
 0x585   : > { %612 = shalt.err (!%p609_p0)
}
 0x586   : > { %529 = dma.vmem_to_hbm [thread:$0]  (%p709_p5), %s747_s14, 16, %s745_s21, %s427_s22  }
 0x587 PF: > { %p535_p1 = scmp.ge.s32.totalorder %s647_s12, 2  ;;  %s451_s4 = sand.u32 1, %s635_s9  }
 0x588   : > { %s452_s5 = scalar_lea.sflag [#allocation3], %s451_s4 }
 0x589   : > { %p532_p2 = pnand %p535_p1, %p713_p6 }
 0x58b   : > { %630 = dma.done.wait (!%p532_p2), %s452_s5, 16  }
 0x58c   : > { %632 = vsyncadd (!%p532_p2), %s452_s5, 4294967280  ;;  %p12_p3 = scmp.ge.s32.totalorder %s696_s15, 4   ;;  %s792_s9 = smov %s639_s10 }
 0x58d   : > { %s793_s10 = smov %s643_s11  ;;  %s794_s11 = smov %s707_s18 }
 0x58e   : > { %s795_s12 = smov %s696_s15  ;;  %14 = sbr.rel (!%p12_p3) target bundleno = 3 (0x3), region = 63 }
 0x595   :  { %456 = vsyncpa [#allocation3], 1 }
 0x596   :  { %458 = vsyncpa [#allocation3 + $0x1], 1 }

</bundles_post_ra>
